<compile_context>
chip_gen: v7x
topology: tpu7x:2x2x1
jax: 0.10.0
libtpu: 0.0.40
codegen_flags: <defaults>
</compile_context>

<pallas_src>
import functools

import jax
import jax.numpy as jnp
from jax import lax
from jax.experimental import pallas as pl
from jax.experimental.pallas import tpu as pltpu


# ----------------------------------------------------------------------------
# Fused kernel: backbone stand-in (tiled over HW) + Linear + BatchNorm1d.
# Grid: (B, HW // hw_tile), both axes "arbitrary" (carry scratch / output).
# ----------------------------------------------------------------------------
def encoder_kernel(x_ref, ws_ref, bs_ref, wl_ref, bl_ref, gamma_ref, beta_ref,
                   out_ref, feats_ref, acc_ref, *, inv_hw):
    # x_ref:     (C, HWt)    bf16  image tile, NCHW kept (HW on lanes)
    # ws_ref:    (C, FEAT)   bf16  1x1-conv stem weight (contract dim 0)
    # bs_ref:    (1, FEAT)   f32   stem bias
    # wl_ref:    (FEAT, Tp)  f32   Linear weight, pre-transposed + lane-padded
    # bl_ref:    (1, Tp)     f32   Linear bias
    # gamma_ref: (1, Tp)     f32   BN weight
    # beta_ref:  (1, Tp)     f32   BN bias
    # out_ref:   (B, Tp)     f32   final output (flushed once, end of grid)
    # feats_ref: (B, FEAT)   f32   pooled features (VMEM scratch)
    # acc_ref:   (1, FEAT)   f32   per-image pooling accumulator
    b = pl.program_id(0)
    t = pl.program_id(1)
    last_t = pl.num_programs(1) - 1
    last_b = pl.num_programs(0) - 1

    # ---- stem GEMM for this spatial tile: (HWt, FEAT) = x^T @ w  (MXU) ----
    conv = lax.dot_general(
        x_ref[...], ws_ref[...],
        dimension_numbers=(((0,), (0,)), ((), ())),
        preferred_element_type=jnp.float32)                       # (HWt, FEAT)
    act = jnp.maximum(conv + bs_ref[...], 0.0)                    # f32 VPU epilogue
    partial = jnp.sum(act, axis=0, keepdims=True)                 # (1, FEAT) XLU sum

    @pl.when(t == 0)
    def _():
        acc_ref[...] = jnp.zeros_like(acc_ref)

    acc_ref[...] += partial

    # ---- finished this image's spatial loop: store its pooled mean row ----
    @pl.when(t == last_t)
    def _():
        feats_ref[pl.ds(b, 1), :] = acc_ref[...] * inv_hw

    # ---- very last grid step: fused Linear + BatchNorm1d (batch stats) ----
    @pl.when(jnp.logical_and(b == last_b, t == last_t))
    def _():
        feats = feats_ref[...]                                     # (B, FEAT) f32
        y = jnp.dot(feats, wl_ref[...],
                    preferred_element_type=jnp.float32) + bl_ref[...]  # (B, Tp)
        mean = jnp.mean(y, axis=0, keepdims=True)
        var = jnp.mean((y - mean) ** 2, axis=0, keepdims=True)     # biased (PyTorch fwd)
        y_hat = (y - mean) * lax.rsqrt(var + 1e-5)
        out_ref[...] = (y_hat * gamma_ref[...] + beta_ref[...]).astype(out_ref.dtype)


def _pick_hw_tile(hw, max_tile):
    """Largest multiple of 128 that divides hw and is <= max_tile (else full hw)."""
    if hw % 128 != 0:
        return hw
    best = 128
    for cand in range(128, min(hw, max_tile) + 1, 128):
        if hw % cand == 0:
            best = cand
    return best


def encoder_cnn_forward(images, params, *, max_hw_tile=2048,
                        compute_dtype=jnp.bfloat16):
    B, C, H, W = images.shape
    HW = H * W
    FEAT = params["w_stem"].shape[0]
    T = params["w_lin"].shape[0]
    T_pad = T if (T % 128 == 0 and T >= 128) else int(pl.cdiv(T, 128) * 128)

    hw_tile = _pick_hw_tile(HW, max_hw_tile)
    n_t = HW // hw_tile

    # One-time layout plumbing in XLA (outside the kernel). NCHW is kept:
    # reshape to (B, C, HW) is free (no NHWC transpose pass over HBM).
    x3d = images.reshape(B, C, HW).astype(compute_dtype)
    w_stem_t = params["w_stem"].T.astype(compute_dtype)                # (C, FEAT)
    b_stem = params["b_stem"].reshape(1, FEAT).astype(jnp.float32)
    w_lin_t = jnp.zeros((FEAT, T_pad), jnp.float32).at[:, :T].set(params["w_lin"].T)
    b_lin = jnp.zeros((1, T_pad), jnp.float32).at[:, :T].set(params["b_lin"])
    gamma = jnp.zeros((1, T_pad), jnp.float32).at[:, :T].set(params["gamma"])
    beta = jnp.zeros((1, T_pad), jnp.float32).at[:, :T].set(params["beta"])

    kernel = functools.partial(encoder_kernel, inv_hw=1.0 / HW)

    out = pl.pallas_call(
        kernel,
        out_shape=jax.ShapeDtypeStruct((B, T_pad), jnp.float32),
        grid_spec=pltpu.PrefetchScalarGridSpec(
            num_scalar_prefetch=0,
            grid=(B, n_t),
            in_specs=[
                pl.BlockSpec((None, C, hw_tile), lambda b, t: (b, 0, t)),
                pl.BlockSpec((C, FEAT), lambda b, t: (0, 0)),
                pl.BlockSpec((1, FEAT), lambda b, t: (0, 0)),
                pl.BlockSpec((FEAT, T_pad), lambda b, t: (0, 0)),
                pl.BlockSpec((1, T_pad), lambda b, t: (0, 0)),
                pl.BlockSpec((1, T_pad), lambda b, t: (0, 0)),
                pl.BlockSpec((1, T_pad), lambda b, t: (0, 0)),
            ],
            out_specs=pl.BlockSpec((B, T_pad), lambda b, t: (0, 0)),
            scratch_shapes=[
                pltpu.VMEM((B, FEAT), jnp.float32),    # pooled features
                pltpu.VMEM((1, FEAT), jnp.float32),    # per-image pool accumulator
            ],
        ),
        compiler_params=pltpu.CompilerParams(
            dimension_semantics=("arbitrary", "arbitrary"),
            vmem_limit_bytes=48 * 1024 * 1024,
        ),
    )(x3d, w_stem_t, b_stem, w_lin_t, b_lin, gamma, beta)
    return out[:, :T]


# ----------------------------------------------------------------------------
# Pure-JAX reference for correctness checking.
# ----------------------------------------------------------------------------
def reference_forward(images, params):
    B, C, H, W = images.shape
    x = images.reshape(B, C, H * W)
    conv = jnp.einsum("fc,bcs->bfs", params["w_stem"], x) \
        + params["b_stem"][None, :, None]
    act = jnp.maximum(conv, 0.0)
    feats = jnp.mean(act, axis=2)                                     # (B, FEAT)
    y = feats @ params["w_lin"].T + params["b_lin"]                   # (B, T)
    mean = jnp.mean(y, axis=0, keepdims=True)
    var = jnp.mean((y - mean) ** 2, axis=0, keepdims=True)
    return (y - mean) / jnp.sqrt(var + 1e-5) * params["gamma"] + params["beta"]


if __name__ == "__main__":
    B, C, H, W = 2, 4, 16, 16      # small NCHW images
    FEAT = 32                      # stand-in for resnet.fc.in_features (2048)
    TARGET = 16                    # target_size

    key = jax.random.PRNGKey(0)
    k_img, k_stem, k_lin = jax.random.split(key, 3)

    images = jax.random.normal(k_img, (B, C, H, W), dtype=jnp.float32)

    params = {
        # frozen backbone stand-in params (deterministic)
        "w_stem": 0.1 * jax.random.normal(k_stem, (FEAT, C), dtype=jnp.float32),
        "b_stem": jnp.zeros((FEAT,), dtype=jnp.float32),
        # EncoderCNN.init_weights(): linear.weight ~ N(0, 0.02), bias = 0
        "w_lin": 0.02 * jax.random.normal(k_lin, (TARGET, FEAT), dtype=jnp.float32),
        "b_lin": jnp.zeros((TARGET,), dtype=jnp.float32),
        # BatchNorm1d defaults: weight=1, bias=0
        "gamma": jnp.ones((TARGET,), dtype=jnp.float32),
        "beta": jnp.zeros((TARGET,), dtype=jnp.float32),
    }

    # max_hw_tile=128 so the small demo actually exercises the spatial
    # accumulation loop (HW=256 -> 2 tiles); at real scale use 1024-2048.
    out = encoder_cnn_forward(images, params, max_hw_tile=128)
    out = jax.block_until_ready(out)

    ref = reference_forward(images, params)
    assert out.shape == (B, TARGET)
    # Tolerance loosened slightly vs pure-f32: stem GEMM operands are bf16
    # (f32 accumulation / pooling / BN stats), per the perf review.
    max_err = float(jnp.max(jnp.abs(out - ref)))
    assert max_err < 5e-3, f"mismatch vs reference, max abs err {max_err}"

    print("KERNEL_OK")
</pallas_src>

<mosaic_0001>
module attributes {stable_mosaic.version = 11 : i64} {
  func.func @encoder_kernel(%arg0: i32, %arg1: i32, %arg2: memref<1x4x128xbf16, #tpu.memory_space<vmem>>, %arg3: memref<4x32xbf16, #tpu.memory_space<vmem>>, %arg4: memref<1x32xf32, #tpu.memory_space<vmem>>, %arg5: memref<32x128xf32, #tpu.memory_space<vmem>>, %arg6: memref<1x128xf32, #tpu.memory_space<vmem>>, %arg7: memref<1x128xf32, #tpu.memory_space<vmem>>, %arg8: memref<1x128xf32, #tpu.memory_space<vmem>>, %arg9: memref<2x128xf32, #tpu.memory_space<vmem>>, %arg10: memref<2x32xf32, #tpu.memory_space<vmem>>, %arg11: memref<1x32xf32, #tpu.memory_space<vmem>>) attributes {dimension_semantics = [#tpu.dimension_semantics<arbitrary>, #tpu.dimension_semantics<arbitrary>], iteration_bounds = array<i64: 2, 2>, scalar_prefetch = 0 : i64, scratch_operands = 2 : i64, tpu.core_type = #tpu.core_type<tc>, window_params = [{transform_indices = @transform_0, window_bounds = array<i64: 1, 4, 128>}, {pipeline_mode = #tpu.pipeline_mode<synchronous>, transform_indices = @transform_1, window_bounds = array<i64: 4, 32>}, {pipeline_mode = #tpu.pipeline_mode<synchronous>, transform_indices = @transform_2, window_bounds = array<i64: 1, 32>}, {pipeline_mode = #tpu.pipeline_mode<synchronous>, transform_indices = @transform_3, window_bounds = array<i64: 32, 128>}, {pipeline_mode = #tpu.pipeline_mode<synchronous>, transform_indices = @transform_4, window_bounds = array<i64: 1, 128>}, {pipeline_mode = #tpu.pipeline_mode<synchronous>, transform_indices = @transform_5, window_bounds = array<i64: 1, 128>}, {pipeline_mode = #tpu.pipeline_mode<synchronous>, transform_indices = @transform_6, window_bounds = array<i64: 1, 128>}, {pipeline_mode = #tpu.pipeline_mode<synchronous>, transform_indices = @transform_7, window_bounds = array<i64: 2, 128>}]} {
    %c0 = arith.constant 0 : index
    %c0_0 = arith.constant 0 : index
    %c0_1 = arith.constant 0 : index
    %0 = vector.load %arg2[%c0, %c0_0, %c0_1] : memref<1x4x128xbf16, #tpu.memory_space<vmem>>, vector<1x4x128xbf16>
    %1 = vector.shape_cast %0 : vector<1x4x128xbf16> to vector<4x128xbf16>
    %c0_2 = arith.constant 0 : index
    %c0_3 = arith.constant 0 : index
    %2 = vector.load %arg3[%c0_2, %c0_3] : memref<4x32xbf16, #tpu.memory_space<vmem>>, vector<4x32xbf16>
    %cst = arith.constant dense<0.000000e+00> : vector<128x32xf32>
    %3 = tpu.matmul %1, %2, %cst {dimension_numbers = #tpu.dot_dimension_numbers<[0], [0], [1], [1], [0, 1, 1, 1], [], []>} : vector<4x128xbf16>, vector<4x32xbf16>, vector<128x32xf32> -> vector<128x32xf32>
    %c0_4 = arith.constant 0 : index
    %c0_5 = arith.constant 0 : index
    %4 = vector.load %arg4[%c0_4, %c0_5] : memref<1x32xf32, #tpu.memory_space<vmem>>, vector<1x32xf32>
    %5 = vector.broadcast %4 : vector<1x32xf32> to vector<128x32xf32>
    %6 = arith.addf %3, %5 : vector<128x32xf32>
    %cst_6 = arith.constant 0.000000e+00 : f32
    %7 = vector.broadcast %cst_6 : f32 to vector<128x32xf32>
    %8 = arith.maximumf %6, %7 : vector<128x32xf32>
    %cst_7 = arith.constant dense<0.000000e+00> : vector<32xf32>
    %9 = vector.multi_reduction <add>, %8, %cst_7 [0] : vector<128x32xf32> to vector<32xf32>
    %10 = vector.shape_cast %9 : vector<32xf32> to vector<1x32xf32>
    %c0_i32 = arith.constant 0 : i32
    %11 = arith.cmpi eq, %arg1, %c0_i32 : i32
    %12 = arith.extui %11 : i1 to i32
    %c0_i32_8 = arith.constant 0 : i32
    %13 = arith.cmpi ne, %12, %c0_i32_8 : i32
    scf.if %13 {
      %cst_17 = arith.constant 0.000000e+00 : f32
      %25 = vector.broadcast %cst_17 : f32 to vector<1x32xf32>
      %c0_18 = arith.constant 0 : index
      %c0_19 = arith.constant 0 : index
      %26 = vector.load %arg11[%c0_18, %c0_19] : memref<1x32xf32, #tpu.memory_space<vmem>>, vector<1x32xf32>
      tpu.vector_store %arg11[%c0_18, %c0_19], %25 {strides = array<i32>} : memref<1x32xf32, #tpu.memory_space<vmem>>, vector<1x32xf32>,
    } else {
    }
    %c0_9 = arith.constant 0 : index
    %c0_10 = arith.constant 0 : index
    %14 = vector.load %arg11[%c0_9, %c0_10] : memref<1x32xf32, #tpu.memory_space<vmem>>, vector<1x32xf32>
    %15 = arith.addf %14, %10 : vector<1x32xf32>
    %c0_11 = arith.constant 0 : index
    %c0_12 = arith.constant 0 : index
    %16 = vector.load %arg11[%c0_11, %c0_12] : memref<1x32xf32, #tpu.memory_space<vmem>>, vector<1x32xf32>
    tpu.vector_store %arg11[%c0_11, %c0_12], %15 {strides = array<i32>} : memref<1x32xf32, #tpu.memory_space<vmem>>, vector<1x32xf32>,
    %c1_i32 = arith.constant 1 : i32
    %17 = arith.cmpi eq, %arg1, %c1_i32 : i32
    %18 = arith.extui %17 : i1 to i32
    %c0_i32_13 = arith.constant 0 : i32
    %19 = arith.cmpi ne, %18, %c0_i32_13 : i32
    scf.if %19 {
      %c0_17 = arith.constant 0 : index
      %c0_18 = arith.constant 0 : index
      %25 = vector.load %arg11[%c0_17, %c0_18] : memref<1x32xf32, #tpu.memory_space<vmem>>, vector<1x32xf32>
      %cst_19 = arith.constant 3.906250e-03 : f32
      %26 = vector.broadcast %cst_19 : f32 to vector<1x32xf32>
      %27 = arith.mulf %25, %26 : vector<1x32xf32>
      %28 = arith.index_cast %arg0 : i32 to index
      %c0_20 = arith.constant 0 : index
      %29 = vector.load %arg10[%28, %c0_20] : memref<2x32xf32, #tpu.memory_space<vmem>>, vector<1x32xf32>
      tpu.vector_store %arg10[%28, %c0_20], %27 {strides = array<i32>} : memref<2x32xf32, #tpu.memory_space<vmem>>, vector<1x32xf32>,
    } else {
    }
    %c1_i32_14 = arith.constant 1 : i32
    %20 = arith.cmpi eq, %arg0, %c1_i32_14 : i32
    %c1_i32_15 = arith.constant 1 : i32
    %21 = arith.cmpi eq, %arg1, %c1_i32_15 : i32
    %22 = arith.andi %20, %21 : i1
    %23 = arith.extui %22 : i1 to i32
    %c0_i32_16 = arith.constant 0 : i32
    %24 = arith.cmpi ne, %23, %c0_i32_16 : i32
    scf.if %24 {
      %c0_17 = arith.constant 0 : index
      %c0_18 = arith.constant 0 : index
      %25 = vector.load %arg10[%c0_17, %c0_18] : memref<2x32xf32, #tpu.memory_space<vmem>>, vector<2x32xf32>
      %c0_19 = arith.constant 0 : index
      %c0_20 = arith.constant 0 : index
      %26 = vector.load %arg5[%c0_19, %c0_20] : memref<32x128xf32, #tpu.memory_space<vmem>>, vector<32x128xf32>
      %cst_21 = arith.constant dense<0.000000e+00> : vector<2x128xf32>
      %27 = tpu.matmul %25, %26, %cst_21 {dimension_numbers = #tpu.dot_dimension_numbers<[1], [0], [0], [1], [0, 0, 1, 1], [], []>} : vector<2x32xf32>, vector<32x128xf32>, vector<2x128xf32> -> vector<2x128xf32>
      %c0_22 = arith.constant 0 : index
      %c0_23 = arith.constant 0 : index
      %28 = vector.load %arg6[%c0_22, %c0_23] : memref<1x128xf32, #tpu.memory_space<vmem>>, vector<1x128xf32>
      %29 = vector.broadcast %28 : vector<1x128xf32> to vector<2x128xf32>
      %30 = arith.addf %27, %29 : vector<2x128xf32>
      %cst_24 = arith.constant dense<0.000000e+00> : vector<128xf32>
      %31 = vector.multi_reduction <add>, %30, %cst_24 [0] : vector<2x128xf32> to vector<128xf32>
      %32 = vector.shape_cast %31 : vector<128xf32> to vector<1x128xf32>
      %cst_25 = arith.constant 2.000000e+00 : f32
      %33 = vector.broadcast %cst_25 : f32 to vector<1x128xf32>
      %34 = arith.divf %32, %33 : vector<1x128xf32>
      %35 = vector.broadcast %34 : vector<1x128xf32> to vector<2x128xf32>
      %36 = arith.subf %30, %35 : vector<2x128xf32>
      %37 = arith.mulf %36, %36 : vector<2x128xf32>
      %cst_26 = arith.constant dense<0.000000e+00> : vector<128xf32>
      %38 = vector.multi_reduction <add>, %37, %cst_26 [0] : vector<2x128xf32> to vector<128xf32>
      %39 = vector.shape_cast %38 : vector<128xf32> to vector<1x128xf32>
      %cst_27 = arith.constant 2.000000e+00 : f32
      %40 = vector.broadcast %cst_27 : f32 to vector<1x128xf32>
      %41 = arith.divf %39, %40 : vector<1x128xf32>
      %42 = vector.broadcast %34 : vector<1x128xf32> to vector<2x128xf32>
      %43 = arith.subf %30, %42 : vector<2x128xf32>
      %cst_28 = arith.constant 9.99999974E-6 : f32
      %44 = vector.broadcast %cst_28 : f32 to vector<1x128xf32>
      %45 = arith.addf %41, %44 : vector<1x128xf32>
      %46 = math.rsqrt %45 : vector<1x128xf32>
      %47 = vector.broadcast %46 : vector<1x128xf32> to vector<2x128xf32>
      %48 = arith.mulf %43, %47 : vector<2x128xf32>
      %c0_29 = arith.constant 0 : index
      %c0_30 = arith.constant 0 : index
      %49 = vector.load %arg7[%c0_29, %c0_30] : memref<1x128xf32, #tpu.memory_space<vmem>>, vector<1x128xf32>
      %50 = vector.broadcast %49 : vector<1x128xf32> to vector<2x128xf32>
      %51 = arith.mulf %48, %50 : vector<2x128xf32>
      %c0_31 = arith.constant 0 : index
      %c0_32 = arith.constant 0 : index
      %52 = vector.load %arg8[%c0_31, %c0_32] : memref<1x128xf32, #tpu.memory_space<vmem>>, vector<1x128xf32>
      %53 = vector.broadcast %52 : vector<1x128xf32> to vector<2x128xf32>
      %54 = arith.addf %51, %53 : vector<2x128xf32>
      %c0_33 = arith.constant 0 : index
      %c0_34 = arith.constant 0 : index
      %55 = vector.load %arg9[%c0_33, %c0_34] : memref<2x128xf32, #tpu.memory_space<vmem>>, vector<2x128xf32>
      tpu.vector_store %arg9[%c0_33, %c0_34], %54 {strides = array<i32>} : memref<2x128xf32, #tpu.memory_space<vmem>>, vector<2x128xf32>,
    } else {
    }
    return
  }
  func.func @transform_0(%arg0: i32, %arg1: i32) -> (i32, i32, i32) {
    %c0_i32 = arith.constant 0 : i32
    %c0_i32_0 = arith.constant 0 : i32
    return %arg0, %c0_i32, %arg1 : i32, i32, i32
  }
  func.func @transform_1(%arg0: i32, %arg1: i32) -> (i32, i32) {
    %c0_i32 = arith.constant 0 : i32
    %c0_i32_0 = arith.constant 0 : i32
    %c0_i32_1 = arith.constant 0 : i32
    return %c0_i32, %c0_i32_0 : i32, i32
  }
  func.func @transform_2(%arg0: i32, %arg1: i32) -> (i32, i32) {
    %c0_i32 = arith.constant 0 : i32
    %c0_i32_0 = arith.constant 0 : i32
    %c0_i32_1 = arith.constant 0 : i32
    return %c0_i32, %c0_i32_0 : i32, i32
  }
  func.func @transform_3(%arg0: i32, %arg1: i32) -> (i32, i32) {
    %c0_i32 = arith.constant 0 : i32
    %c0_i32_0 = arith.constant 0 : i32
    %c0_i32_1 = arith.constant 0 : i32
    return %c0_i32, %c0_i32_0 : i32, i32
  }
  func.func @transform_4(%arg0: i32, %arg1: i32) -> (i32, i32) {
    %c0_i32 = arith.constant 0 : i32
    %c0_i32_0 = arith.constant 0 : i32
    %c0_i32_1 = arith.constant 0 : i32
    return %c0_i32, %c0_i32_0 : i32, i32
  }
  func.func @transform_5(%arg0: i32, %arg1: i32) -> (i32, i32) {
    %c0_i32 = arith.constant 0 : i32
    %c0_i32_0 = arith.constant 0 : i32
    %c0_i32_1 = arith.constant 0 : i32
    return %c0_i32, %c0_i32_0 : i32, i32
  }
  func.func @transform_6(%arg0: i32, %arg1: i32) -> (i32, i32) {
    %c0_i32 = arith.constant 0 : i32
    %c0_i32_0 = arith.constant 0 : i32
    %c0_i32_1 = arith.constant 0 : i32
    return %c0_i32, %c0_i32_0 : i32, i32
  }
  func.func @transform_7(%arg0: i32, %arg1: i32) -> (i32, i32) {
    %c0_i32 = arith.constant 0 : i32
    %c0_i32_0 = arith.constant 0 : i32
    %c0_i32_1 = arith.constant 0 : i32
    return %c0_i32, %c0_i32_0 : i32, i32
  }
}

</mosaic_0001>

<bundles_post_ra>
// kernel: tpu_custom_call.1
= control target key start
LH: loop header
LB: loop body
LE: loop exit
PB: predicated region body
PF: predicated region fallthrough
CT: control target
= control target key end

     0   :  { %s1416_s0 = inlined_call_operand.hbm [shape: bf16[2,4,256], index: 0, kind: input, shape index: {}]   ;;  %s1417_s1 = inlined_call_operand.vmem [shape: bf16[4,32], index: 1, kind: input, shape index: {}]   ;;  %s1418_s2 = inlined_call_operand.vmem [shape: f32[1,32], index: 2, kind: input, shape index: {}]   ;;  %s1419_s3 = inlined_call_operand.hbm [shape: f32[32,128], index: 3, kind: input, shape index: {}]   ;;  %s1420_s4 = inlined_call_operand.vmem [shape: f32[1,128], index: 4, kind: input, shape index: {}]   ;;  %s1421_s5 = inlined_call_operand.vmem [shape: f32[1,128], index: 5, kind: input, shape index: {}]   ;;  %s1422_s6 = inlined_call_operand.vmem [shape: f32[1,128], index: 6, kind: input, shape index: {}]   ;;  %s1423_s7 = inlined_call_operand.hbm [shape: f32[2,128], index: 7, kind: output, shape index: {}]  }
   0x1   :  { %1431 = sst [smem:[#allocation14_spill]] %s1419_s3 }
   0x2   :  { %1432 = sst [smem:[#allocation15_spill]] %s1421_s5 }
   0x3   :  { %1433 = sst [smem:[#allocation16_spill]] %s1422_s6 }
   0x4   :  { %1434 = sst [smem:[#allocation17_spill]] %s1423_s7 }
   0x5   :  { %12 = vsyncpa [#allocation5], 0 }
   0x6   :  { %14 = vsyncpa [#allocation5 + $0x1], 0 }
   0x7   :  { %15 = vsyncpa [#allocation8], 0 }
   0x8   :  { %16 = vsyncpa [#allocation6], 0  ;;  %s1137_s24 = smov 0   ;;  %s1139_s25 = smov 0  }
   0x9   :  { %s1141_s26 = smov 0   ;;  %s1143_s27 = smov 0  }
   0xa   :  { %s1145_s28 = smov 0   ;;  %s1147_s29 = smov 0  }
   0xb   :  { %s1149_s30 = smov 0   ;;  %s1151_s8 = smov 0  }
   0xc LB: > { %s1428_s9 = sadd.s32 4294967295, %s1086_s8   ;;  %p56_p0 = scmp.ne.s32.totalorder %s1062_s25, %s1058_s24  ;;  %s1086_s8 = sphi %s1151_s8, %s22_s8   ;;  %s1082_s30 = sphi %s1149_s30, %s1458_s30   ;;  %s1078_s29 = sphi %s1147_s29, %s1457_s29   ;;  %s1074_s28 = sphi %s1145_s28, %s1456_s28   ;;  %s1070_s27 = sphi %s1143_s27, %s1455_s27   ;;  %s1066_s26 = sphi %s1141_s26, %s1454_s26   ;;  %s1062_s25 = sphi %s1139_s25, %s1453_s25   ;;  %s1058_s24 = sphi %s1137_s24, %s1452_s24  }
   0xd   : > { %p1179_p1 = scmp.eq.s32.totalorder %s1428_s9, 0  ;;  %p749_p2 = scmp.ge.s32.totalorder %s1086_s8, 1 }
   0xe   : > { %p214_p3 = scmp.lt.s32.totalorder %s1086_s8, 5  ;;  %s1088_s13 = smov [#allocation7]  }
   0xf   : > { %s1435_s10 = scalar_select %p1179_p1, 1, 0 }
  0x10   : > { %p1187_p4 = por %p1179_p1, %p56_p0  ;;  %p1191_p5 = pnand %p749_p2, %p214_p3 }
  0x11   : > { %s232_s14 = sshll.u32 %s1088_s13, 4  ;;  %s1439_s3 = sld [smem:[#allocation14_spill]]  ;;  %s233_s14 = int_to_ptr.vmem [resolvable:$true] %s232_s14 }
  0x12   : > { %s1436_s11 = scalar_select %p1187_p4, 1, 0 }
  0x13   : > { %s1437_s12 = scalar_select %p1191_p5, 1, 0 }
  0x14   : > { %p840_p6 = pneg %p1191_p5 }
  0x16   : > { %p1199_p7 = pnand %p840_p6, %p1179_p1 }
  0x17   : > { %s928_s18 = scalar_lea.hbm %s1439_s3, 512 }
  0x18   : > { %p929_p8 = scmp.ne.s32.totalorder %s1439_s3, %s928_s18  ;;  %p930_p9 = pneg %p1199_p7 }
  0x19   : > { %p935_p12 = scmp.lt.u32.totalorder %s928_s18, %s1439_s3 }
  0x1a   : > { %p931_p10 = pnand %p930_p9, %p929_p8 }
  0x1c   : > { %p932_p11 = pneg %p931_p10 }
  0x1e   : > { %p937_p13 = pnand %p935_p12, %p932_p11 }
  0x20   : > { %940 = shalt.err (!%p937_p13)
}
  0x21   : > { %s941_s23 = scalar_lea.vmem %s233_s14, 512  ;;  %p949_p6 = scmp.lt.s32.totalorder %s233_s14, %s233_s14 }
  0x22   : > { %p942_p0 = scmp.ne.s32.totalorder %s233_s14, %s941_s23  ;;  %p950_p1 = scmp.lt.s32.totalorder %s941_s23, %s941_s23 }
  0x24   : > { %p944_p2 = pnand %p942_p0, %p930_p9  ;;  %p951_p4 = por %p950_p1, %p949_p6 }
  0x26   : > { %p945_p3 = pneg %p944_p2 }
  0x28   : > { %p952_p5 = pnand %p951_p4, %p945_p3 }
  0x2a   : > { %955 = shalt.err (!%p952_p5)
}
  0x2b   : > { %s1089_s24 = smov 128   ;;  %s1090_s13 = smov 8  }
  0x2c   : > { %843 = dma.hbm_to_vmem [thread:$0]  (!%p1199_p7), %s1439_s3, 512, %s233_s14, [#allocation8], %s1089_s24, %s1089_s24, %s1090_s13  }
  0x2d   : > { %s31_s18 = sadd.s32 1, %s1078_s29  ;;  %s34_s19 = sadd.s32 1, %s1082_s30 }
  0x2e   : > { %p32_p1 = scmp.ge.s32.totalorder %s31_s18, 2  ;;  %s43_s20 = sadd.s32 1, %s1066_s26 }
  0x2f   : > { %p50_p4 = scmp.ne.s32.totalorder %s1066_s26, %s1062_s25  ;;  %p51_p5 = scmp.eq.s32.totalorder %s1086_s8, 0 }
  0x30   : > { %s1460_s18 = smov (%p32_p1, %s31_s18), 0  ;;  %s1462_s19 = smov (!%p32_p1, %s34_s19), %s1082_s30 }
  0x31   : > { %1440 = sst [smem:[#allocation13_spill]] %s1460_s18  ;;  %p36_p8 = scmp.ge.s32.totalorder %s1462_s19, 2 }
  0x32   : > { %s39_s15 = ssub.s32 %s1078_s29, %s1460_s18  ;;  %p849_p9 = scmp.lt.s32.totalorder %s1086_s8, 4 }
  0x33   : > { %s255_s21 = sand.u32 1, %s1066_s26   ;;  %s1464_s19 = smov (%p36_p8, %s1462_s19), 0 }
  0x34   : > { %p1234_p7 = por %p51_p5, %p50_p4  ;;  %s752_s22 = sshll.u32 %s255_s21, 1 }
  0x35   : > { %s38_s23 = ssub.s32 %s1082_s30, %s1464_s19  ;;  %s753_s13 = sshll.u32 %s1082_s30, 1 }
  0x36   : > { %s40_s24 = sor.u32 %s39_s15, %s38_s23  ;;  %s264_s16 = sadd.s32 %s1078_s29, %s753_s13 }
  0x37   : > { %p41_p10 = scmp.eq.s32.totalorder %s40_s24, 0  ;;  %s754_s17 = sshll.u32 %s264_s16, 5 }
  0x38   : > { %s259_s9 = scalar_lea.vmem [#allocation4], %s752_s22  ;;  %s1248_s5 = scalar_lea.hbm %s1416_s0, %s754_s17 }
  0x39   : > { %s268_s3 = sshll.u32 %s259_s9, 4  ;;  %p1256_p11 = pnand %p849_p9, %p1234_p7  ;;  %s1250_s3 = int_to_ptr.vmem [resolvable:$true] %s268_s3 }
  0x3a   : > { %s1243_s18 = scalar_select %p41_p10, %s1066_s26, %s43_s20  }
  0x3b   : > { %s256_s9 = scalar_lea.sflag [#allocation5], %s255_s21  ;;  %s956_s20 = scalar_lea.hbm %s1248_s5, 32 }
  0x3c   : > { %p957_p12 = scmp.ne.s32.totalorder %s1248_s5, %s956_s20  ;;  %p958_p13 = pneg %p1256_p11 }
  0x3d   : > { %s961_s14 = scalar_lea.hbm %s1416_s0, 128  ;;  %p962_p3 = scmp.lt.u32.totalorder %s1248_s5, %s1416_s0 }
  0x3e   : > { %p959_p0 = pnand %p958_p13, %p957_p12  ;;  %p963_p6 = scmp.lt.u32.totalorder %s961_s14, %s956_s20 }
  0x3f   : > { %p965_p4 = scmp.lt.u32.totalorder %s956_s20, %s1248_s5 }
  0x40   : > { %p960_p2 = pneg %p959_p0  ;;  %p964_p1 = por %p963_p6, %p962_p3 }
  0x42   : > { %p966_p5 = por %p965_p4, %p964_p1 }
  0x44   : > { %p967_p8 = pnand %p966_p5, %p960_p2 }
  0x46   : > { %970 = shalt.err (!%p967_p8)
}
  0x47   : > { %s971_s21 = scalar_lea.vmem %s1250_s3, 32  ;;  %s1091_s24 = smov [#allocation4]  }
  0x48   : > { %p972_p9 = scmp.ne.s32.totalorder %s1250_s3, %s971_s21  ;;  %s976_s13 = sshll.u32 %s1091_s24, 4  ;;  %s977_s13 = int_to_ptr.vmem [resolvable:$false] %s976_s13 }
  0x49   : > { %s978_s16 = scalar_lea.vmem %s977_s13, 64  ;;  %p979_p12 = scmp.lt.s32.totalorder %s1250_s3, %s977_s13 }
  0x4a   : > { %p974_p7 = pnand %p972_p9, %p958_p13  ;;  %p980_p0 = scmp.lt.s32.totalorder %s978_s16, %s971_s21 }
  0x4c   : > { %p975_p10 = pneg %p974_p7  ;;  %p981_p3 = por %p980_p0, %p979_p12 }
  0x4e   : > { %p982_p6 = pnand %p981_p3, %p975_p10 }
  0x50   : > { %985 = shalt.err (!%p982_p6)
}
  0x51   : > { %847 = dma.hbm_to_vmem [thread:$0]  (!%p1256_p11), %s1248_s5, 32, %s1250_s3, %s256_s9  }
  0x52   : > { %p1443_p2 = scmp.ne.s32.totalorder %s1437_s12, 0 }
  0x53   : > { %s279_s17 = sand.u32 (!%p1443_p2), 1, %s1062_s25   ;;  %p1444_p13 = scmp.ne.s32.totalorder (!%p1443_p2), %s1436_s11, 0 }
  0x54   : > { %277 = sbr.rel (%p1443_p2) target bundleno = 790 (0x316), region = 48  ;;  %s756_s20 = sshll.u32 (!%p1443_p2), %s279_s17, 1 }
  0x55   : > { %s280_s6 = scalar_lea.sflag (!%p1443_p2), [#allocation5], %s279_s17  ;;  %s283_s7 = scalar_lea.vmem (!%p1443_p2), [#allocation4], %s756_s20 }
  0x5b   : > { %1045 = dma.done.wait (%p1444_p13), %s280_s6, 32  }
  0x5c   : > { %1047 = vsyncadd (%p1444_p13), %s280_s6, 4294967264  ;;  %p1445_p1 = scmp.ne.s32.totalorder %s1435_s10, 0 }
  0x5e   : > { %1049 = dma.done.wait (%p1445_p1), [#allocation8], 512  }
  0x5f   : > { %1051 = vsyncadd (%p1445_p1), [#allocation8], 4294966784  ;;  %vm364_vm0 = vcmask 1041408   ;;  %v314_v0 = vld [vmem:[%s283_s7] sm:$0x3]  ;;  %vm339_vm1 = vcmask 31744  }
  0x60   : > { %v315_v1 = vld [vmem:[%s1417_s1] sm:$0x3]  ;;  %323 = vxpose.xlu0.c.b16.start.end [1/1] (short) %v314_v0, 128  ;;  %vm481_vm2 = vcmask 261120   ;;  %p767_p11 = scmp.ne.s32.totalorder %s1070_s27, 0 }
  0x61   : > { %828 = vmatprep.subr.msk.bf16.mxu0 %vm364_vm0, %v315_v1  ;;  %v366_v2 = vsel %vm364_vm0, %v315_v1, 0  ;;  %829 = vmatprep.subr.msk.bf16.mxu1 %vm364_vm0, %v315_v1  ;;  %v1313_v11 = vld [vmem:[%s1418_s2] ss:$0 sm:$0xff]  ;;  %vm523_vm3 = vcmask (!%p767_p11), 253952  }
  0x62   : > { %792 = vmatpush3.bf16.msra.mxu0 %v366_v2  ;;  %827 = vmatpush3.bf16.msra.mxu1 %v366_v2 }
  0xc6   : > { %v331_v3 = vpop.trf.xlu0 }
  0xc7   : > { %793 = vmatprep.mubr.msk.bf16.mxu0 %vm339_vm1, %v331_v3 }
  0xca   : > { %v332_v4 = vpop.trf.xlu0 }
  0xcb   : > { %794 = vmatmul.mubr.msk.bf16.vlgmr.msra.gmra.mrb[0].mxu0 %vm339_vm1, %v332_v4 }
  0xce   : > { %v333_v5 = vpop.trf.xlu0 }
  0xcf   : > { %797 = vmatprep.mubr.msk.bf16.mxu0 %vm339_vm1, %v333_v5 }
  0xd2   : > { %v334_v6 = vpop.trf.xlu0 }
  0xd3   : > { %798 = vmatmul.mubr.msk.bf16.gmra.mrb[4].mxu0 %vm339_vm1, %v334_v6 }
  0xd6   : > { %v335_v7 = vpop.trf.xlu0 }
  0xd7   : > { %801 = vmatprep.mubr.msk.bf16.mxu1 %vm339_vm1, %v335_v7 }
  0xda   : > { %v336_v8 = vpop.trf.xlu0 }
  0xdb   : > { %802 = vmatmul.mubr.msk.bf16.vlgmr.msra.gmra.mrb[0].mxu1 %vm339_vm1, %v336_v8 }
  0xde   : > { %v337_v9 = vpop.trf.xlu0 }
  0xdf   : > { %805 = vmatprep.mubr.msk.bf16.mxu1 %vm339_vm1, %v337_v9 }
  0xe2   : > { %v338_v10 = vpop.trf.xlu0 }
  0xe3   : > { %806 = vmatmul.mubr.msk.bf16.gmra.mrb[4].mxu1 %vm339_vm1, %v338_v10 }
 0x19e   : > { %v795_v12 = vpop.f32.mrb[0].mxu0 }
 0x19f   : > { %v402_v13 = vpop.f32.mrb[1].mxu0  ;;  %v411_v14 = vadd.f32 %v795_v12, %v1313_v11 }
 0x1a0   : > { %v403_v15 = vadd.f32 %v1313_v11, %v402_v13  ;;  %v796_v16 = vpop.f32.mrb[2].mxu0 }
 0x1a1   : > { %v405_v17 = vpop.f32.mrb[3].mxu0  ;;  %v414_v19 = vadd.f32 %v796_v16, %v1313_v11  ;;  %v467_v21 = vmax.f32 %v411_v14, 0.0 }
 0x1a2   : > { %v465_v18 = vmax.f32 %v403_v15, 0.0  ;;  %v406_v20 = vadd.f32 %v1313_v11, %v405_v17 }
 0x1a3   : > { %v468_v24 = vmax.f32 %v414_v19, 0.0  ;;  %v485_v29 = vsel %vm481_vm2, %v467_v21, 0.0 }
 0x1a4   : > { %v466_v22 = vmax.f32 %v406_v20, 0.0  ;;  %v482_v23 = vsel %vm481_vm2, %v465_v18, 0.0 }
 0x1a5   : > { %v487_v35 = vsel %vm481_vm2, %v468_v24, 0.0 }
 0x1a6   : > { %v483_v25 = vsel %vm481_vm2, %v466_v22, 0.0  ;;  %v799_v26 = vpop.f32.mrb[4].mxu0 }
 0x1a7   : > { %v484_v27 = vadd.f32 %v483_v25, %v482_v23  ;;  %v418_v28 = vpop.f32.mrb[5].mxu0  ;;  %v427_v30 = vadd.f32 %v799_v26, %v1313_v11 }
 0x1a8   : > { %v419_v31 = vadd.f32 %v1313_v11, %v418_v28  ;;  %v800_v32 = vpop.f32.mrb[6].mxu0 }
 0x1a9   : > { %v486_v33 = vadd.f32 %v485_v29, %v484_v27  ;;  %v421_v34 = vpop.f32.mrb[7].mxu0  ;;  %v430_v37 = vadd.f32 %v800_v32, %v1313_v11  ;;  %v471_v40 = vmax.f32 %v427_v30, 0.0 }
 0x1aa   : > { %v469_v36 = vmax.f32 %v419_v31, 0.0  ;;  %v422_v38 = vadd.f32 %v1313_v11, %v421_v34 }
 0x1ab   : > { %v488_v39 = vadd.f32 %v487_v35, %v486_v33  ;;  %v472_v44 = vmax.f32 %v430_v37, 0.0  ;;  %v493_v49 = vsel %vm481_vm2, %v471_v40, 0.0  ;;  %v1092_v33 = vmov (!%p767_p11), 0.0  }
 0x1ac   : > { %v489_v41 = vsel %vm481_vm2, %v469_v36, 0.0  ;;  %v470_v42 = vmax.f32 %v422_v38, 0.0  ;;  %524 = vst.msk [vmem:[#allocation3] sm:$0x1] (!%p767_p11), %vm523_vm3, %v1092_v33 }
 0x1ad   : > { %v490_v43 = vadd.f32 %v489_v41, %v488_v39  ;;  %v495_v55 = vsel %vm481_vm2, %v472_v44, 0.0 }
 0x1ae   : > { %v491_v45 = vsel %vm481_vm2, %v470_v42, 0.0  ;;  %v803_v46 = vpop.f32.mrb[0].mxu1 }
 0x1af   : > { %v492_v47 = vadd.f32 %v491_v45, %v490_v43  ;;  %v434_v48 = vpop.f32.mrb[1].mxu1  ;;  %v443_v50 = vadd.f32 %v803_v46, %v1313_v11 }
 0x1b0   : > { %v435_v51 = vadd.f32 %v1313_v11, %v434_v48  ;;  %v804_v52 = vpop.f32.mrb[2].mxu1 }
 0x1b1   : > { %v494_v53 = vadd.f32 %v493_v49, %v492_v47  ;;  %v437_v54 = vpop.f32.mrb[3].mxu1  ;;  %v446_v57 = vadd.f32 %v804_v52, %v1313_v11  ;;  %v475_v60 = vmax.f32 %v443_v50, 0.0 }
 0x1b2   : > { %v473_v56 = vmax.f32 %v435_v51, 0.0  ;;  %v438_v58 = vadd.f32 %v1313_v11, %v437_v54 }
 0x1b3   : > { %v496_v59 = vadd.f32 %v495_v55, %v494_v53  ;;  %v476_v0 = vmax.f32 %v446_v57, 0.0  ;;  %v501_v5 = vsel %vm481_vm2, %v475_v60, 0.0 }
 0x1b4   : > { %v497_v61 = vsel %vm481_vm2, %v473_v56, 0.0  ;;  %v474_v62 = vmax.f32 %v438_v58, 0.0 }
 0x1b5   : > { %v498_v63 = vadd.f32 %v497_v61, %v496_v59  ;;  %v503_v12 = vsel %vm481_vm2, %v476_v0, 0.0 }
 0x1b6   : > { %v499_v1 = vsel %vm481_vm2, %v474_v62, 0.0  ;;  %v807_v2 = vpop.f32.mrb[4].mxu1 }
 0x1b7   : > { %v500_v3 = vadd.f32 %v499_v1, %v498_v63  ;;  %v450_v4 = vpop.f32.mrb[5].mxu1  ;;  %v459_v6 = vadd.f32 %v807_v2, %v1313_v11 }
 0x1b8   : > { %v451_v7 = vadd.f32 %v1313_v11, %v450_v4  ;;  %v808_v8 = vpop.f32.mrb[6].mxu1 }
 0x1b9   : > { %v502_v9 = vadd.f32 %v501_v5, %v500_v3  ;;  %v453_v10 = vpop.f32.mrb[7].mxu1  ;;  %v462_v14 = vadd.f32 %v808_v8, %v1313_v11  ;;  %v479_v17 = vmax.f32 %v459_v6, 0.0 }
 0x1ba   : > { %v477_v13 = vmax.f32 %v451_v7, 0.0  ;;  %v454_v15 = vadd.f32 %v1313_v11, %v453_v10 }
 0x1bb   : > { %v504_v16 = vadd.f32 %v503_v12, %v502_v9  ;;  %v480_v21 = vmax.f32 %v462_v14, 0.0  ;;  %v509_v24 = vsel %vm481_vm2, %v479_v17, 0.0 }
 0x1bc   : > { %v505_v18 = vsel %vm481_vm2, %v477_v13, 0.0  ;;  %v478_v19 = vmax.f32 %v454_v15, 0.0 }
 0x1bd   : > { %v506_v20 = vadd.f32 %v505_v18, %v504_v16  ;;  %v511_v26 = vsel %vm481_vm2, %v480_v21, 0.0 }
 0x1be   : > { %v507_v22 = vsel %vm481_vm2, %v478_v19, 0.0 }
 0x1bf   : > { %v508_v23 = vadd.f32 %v507_v22, %v506_v20 }
 0x1c1   : > { %v510_v25 = vadd.f32 %v509_v24, %v508_v23 }
 0x1c3   : > { %v512_v27 = vadd.f32 %v511_v26, %v510_v25 }
 0x1c5   : > { %v513_v28 = vrot.slane %v512_v27, 4 }
 0x1c7   : > { %v514_v29 = vadd.f32 %v513_v28, %v512_v27 }
 0x1c9   : > { %v515_v30 = vrot.slane %v514_v29, 2  ;;  %522 = sbr.rel (%p767_p11) target bundleno = 464 (0x1d0), region = 60 }
 0x1cb   : > { %v516_v11 = vadd.f32 %v515_v30, %v514_v29 }
 0x1cd   : > { %v517_v31 = vrot.slane %v516_v11, 1 }
 0x1cf   : > { %v518_v32 = vadd.f32 %v517_v31, %v516_v11 }
 0x1d0 PF: > { %v525_v34 = vld [vmem:[#allocation3] sm:$0x1]  ;;  %vm527_vm4 = vcmask 253952   ;;  %p529_p4 = scmp.eq.s32.totalorder %s1070_s27, 1  ;;  %p768_p5 = scmp.ne.s32.totalorder %s1070_s27, 1 }
 0x1d1   : > { %v526_v35 = vadd.f32 %v525_v34, %v518_v32  ;;  %s535_s12 = scalar_lea.vmem (!%p768_p5), [#allocation2], %s1074_s28 }
 0x1d2   : > { %532 = sbr.rel (%p768_p5) target bundleno = 478 (0x1de), region = 64 }
 0x1d3   : > { %528 = vst.msk [vmem:[#allocation3] sm:$0x1] %vm527_vm4, %v526_v35 }
 0x1da   : > { %v533_v36 = vld [vmem:[#allocation3] sm:$0x1] }
 0x1db   : > { %v534_v37 = vmul.f32 0.00390625, %v533_v36 }
 0x1dd   : > { %536 = vst.msk [vmem:[%s535_s12] sm:$0x1] %vm527_vm4, %v534_v37 }
 0x1de PF: > { %p537_p8 = scmp.eq.s32.totalorder %s1074_s28, 1 }
 0x1e0   : > { %p538_p9 = pnand %p537_p8, %p529_p4 }
 0x1e1   : > { %v543_v38 = vld [vmem:[#allocation7] sm:$0xff] (!%p538_p9)  ;;  %v544_v39 = vld [vmem:[#allocation7 + $0x8] sm:$0xff] (!%p538_p9)  ;;  %v545_v40 = vld [vmem:[#allocation7 + $0x10] sm:$0xff] (!%p538_p9)  ;;  %v1093_v41 = vmov (!%p538_p9), 0.0|0.0   ;;  %vm1094_vm5 = vmmov (!%p538_p9), 0   ;;  %v1095_v44 = vmov (!%p538_p9), 0.0  }
 0x1e2   : > { %541 = sbr.rel (%p538_p9) target bundleno = 759 (0x2f7), region = 68  ;;  %820 = vmatprep.subr.bf16.mxu0 (!%p538_p9), %v1093_v41  ;;  %v821_v42 = vpack.c.bf16 (!%p538_p9), %v544_v39, %v543_v38  ;;  %v546_v43 = vld [vmem:[#allocation7 + $0x18] sm:$0xff] (!%p538_p9)  ;;  %817 = vmatprep.mubr.msk.f32.mxu0 (!%p538_p9), %vm1094_vm5, %v1095_v44  ;;  %s1446_s14 = sld [smem:[#allocation15_spill]] (!%p538_p9) }
 0x1e3   : > { %v824_v45 = vpack.c.bf16 (!%p538_p9), %v546_v43, %v545_v40  ;;  %v769_v47 = vld [vmem:[%s1420_s4] ss:$0 sm:$0xff] (!%p538_p9)  ;;  %s1447_s21 = sld [smem:[#allocation16_spill]] (!%p538_p9) }
 0x1e4   : > { %822 = vmatpush3.bf16.msra.mxu0 (!%p538_p9), %v821_v42  ;;  %v542_v46 = vld [vmem:[#allocation2] sm:$0x3] (!%p538_p9) }
 0x1e5   : > { %823 = vmatprep.subr.bf16.mxu0 (!%p538_p9), %v1093_v41 }
 0x1e8   : > { %825 = vmatpush3.bf16.msra.mxu0 (!%p538_p9), %v824_v45  ;;  %v771_v7 = vld [vmem:[%s1446_s14] ss:$0 sm:$0xff] (!%p538_p9) }
 0x1e9   : > { %v772_v9 = vld [vmem:[%s1447_s21] ss:$0 sm:$0xff] }
 0x1eb   : > { %818 = vmatmul.mubr.msk.f32.vlgmr.msra.gmra.mrb[0].mxu0 %vm481_vm2, %v542_v46 }
 0x2be   : > { %v623_v48 = vpop.f32.mrb[0].mxu0 }
 0x2bf   : > { %v624_v49 = vadd.f32 %v769_v47, %v623_v48  ;;  %v819_v50 = vpop.f32.mrb[1].mxu0 }
 0x2c1   : > { %v627_v51 = vsel %vm364_vm0, %v624_v49, 0.0 }
 0x2c2   : > { %v628_v52 = vrot.slane %v627_v51, 4 }
 0x2c4   : > { %v629_v53 = vadd.f32 %v628_v52, %v627_v51 }
 0x2c6   : > { %v630_v54 = vrot.slane %v629_v53, 2 }
 0x2c8   : > { %v631_v55 = vadd.f32 %v630_v54, %v629_v53 }
 0x2ca   : > { %v632_v56 = vrot.slane %v631_v55, 1 }
 0x2cc   : > { %v633_v57 = vadd.f32 %v632_v56, %v631_v55 }
 0x2ce   : > { %v635_v58 = vmul.f32 0.5, %v633_v57 }
 0x2d0   : > { %v636_v59 = vsub.f32 %v624_v49, %v635_v58 }
 0x2d2   : > { %v637_v60 = vmul.f32 %v636_v59, %v636_v59 }
 0x2d4   : > { %v638_v61 = vsel %vm364_vm0, %v637_v60, 0.0 }
 0x2d5   : > { %v639_v62 = vrot.slane %v638_v61, 4 }
 0x2d7   : > { %v640_v63 = vadd.f32 %v639_v62, %v638_v61 }
 0x2d9   : > { %v641_v0 = vrot.slane %v640_v63, 2 }
 0x2db   : > { %v642_v1 = vadd.f32 %v641_v0, %v640_v63 }
 0x2dd   : > { %v643_v2 = vrot.slane %v642_v1, 1 }
 0x2df   : > { %v644_v3 = vadd.f32 %v643_v2, %v642_v1 }
 0x2e1   : > { %v645_v4 = vmul.f32 0.5, %v644_v3 }
 0x2e3   : > { %v646_v5 = vadd.f32 1e-05, %v645_v4 }
 0x2e5   : > { %926 = vrsqrt.f32 %v646_v5 }
 0x2ef   : > { %v927_v6 = vpop.eup %926 }
 0x2f0   : > { %v648_v8 = vmul.f32 %v927_v6, %v636_v59 }
 0x2f2   : > { %v656_v10 = vmul.f32 %v771_v7, %v648_v8 }
 0x2f4   : > { %v664_v12 = vadd.f32 %v772_v9, %v656_v10 }
 0x2f6   : > { %665 = vst [vmem:[#allocation9] sm:$0x3] %v664_v12 }
 0x2f7 PF: > { %s1448_s24 = sadd.s32 4294967295, %s1086_s8   ;;  %s1096_s16 = smov [#allocation9]  }
 0x2f8   : > { %p1366_p7 = scmp.eq.s32.totalorder %s1448_s24, 3  ;;  %s673_s17 = sshll.u32 %s1096_s16, 4  ;;  %s674_s17 = int_to_ptr.vmem [resolvable:$true] %s673_s17 }
 0x2f9   : > { %s986_s20 = scalar_lea.vmem %s674_s17, 32  ;;  %p993_p3 = scmp.lt.s32.totalorder %s674_s17, %s674_s17 }
 0x2fa   : > { %p987_p10 = scmp.ne.s32.totalorder %s674_s17, %s986_s20  ;;  %p994_p6 = scmp.lt.s32.totalorder %s986_s20, %s986_s20 }
 0x2fc   : > { %p988_p12 = pnand %p987_p10, %p1366_p7  ;;  %p995_p2 = por %p994_p6, %p993_p3 }
 0x2fe   : > { %p989_p0 = pneg %p988_p12 }
 0x300   : > { %p996_p13 = pnand %p995_p2, %p989_p0 }
 0x302   : > { %999 = shalt.err (!%p996_p13)
}
 0x303   : > { %s1450_s3 = sld [smem:[#allocation17_spill]] }
 0x309   : > { %s1000_s5 = scalar_lea.hbm %s1450_s3, 32 }
 0x30a   : > { %p1001_p1 = scmp.ne.s32.totalorder %s1450_s3, %s1000_s5  ;;  %p1006_p5 = scmp.lt.u32.totalorder %s1000_s5, %s1450_s3 }
 0x30c   : > { %p1002_p11 = pnand %p1001_p1, %p1366_p7 }
 0x30e   : > { %p1003_p4 = pneg %p1002_p11 }
 0x310   : > { %p1008_p8 = pnand %p1006_p5, %p1003_p4 }
 0x312   : > { %1011 = shalt.err (!%p1008_p8)
}
 0x313   : > { %837 = dma.vmem_to_hbm [thread:$0]  (%p1366_p7), %s674_s17, 32, %s1450_s3, [#allocation6]  }
 0x314   : > { %1053 = dma.done.wait (%p1366_p7), [#allocation6], 32  }
 0x315   : > { %1055 = vsyncadd (%p1366_p7), [#allocation6], 4294967264 }
 0x316 PF: > { %s22_s8 = sadd.s32 1, %s1086_s8   ;;  %s1451_s9 = sld [smem:[#allocation13_spill]] }
 0x317   : > { %p19_p9 = scmp.ge.s32.totalorder %s22_s8, 6   ;;  %s1452_s24 = smov %s1062_s25 }
 0x318   : > { %s1453_s25 = smov %s1066_s26  ;;  %s1454_s26 = smov %s1243_s18 }
 0x319   : > { %s1455_s27 = smov %s1078_s29  ;;  %s1456_s28 = smov %s1082_s30 }
 0x31a   : > { %s1458_s30 = smov %s1464_s19  ;;  %21 = sbr.rel (!%p19_p9) target bundleno = 12 (0xc), region = 102 }
 0x31c   : > { %s1457_s29 = smov %s1451_s9 }
 0x321   :  { %686 = vsyncpa [#allocation5], 1 }
 0x322   :  { %688 = vsyncpa [#allocation5 + $0x1], 1 }
 0x323   :  { %689 = vsyncpa [#allocation8], 1 }
 0x324   :  { %690 = vsyncpa [#allocation6], 1 }
 0x325   :  { %692 = vsyncpa [#allocation6 + $0x1], 1 }

</bundles_post_ra>
